<compile_context>
chip_gen: v6e
topology: v6e:2x2x1
jax: 0.10.0
libtpu: 0.0.40
codegen_flags: <defaults>
</compile_context>

<pallas_src>
import jax
import jax.numpy as jnp
from jax.experimental import pallas as pl
from jax.experimental.pallas import tpu as pltpu


def _conv1d_block_kernel(alpha_ref, x_ref, w_ref, b_ref, res_ref, enc_ref):
    # alpha_ref: (1, 1)          SMEM   (PReLU single scalar slope)
    # x_ref:     (1, C_in, tl)   VMEM   (one batch element, one L tile)
    # w_ref:     (C_out, C_in)   VMEM   (resident across the grid)
    # b_ref:     (C_out, 1)      VMEM   (resident across the grid)
    x = x_ref[0]                                         # (C_in, tl)
    y = jnp.dot(w_ref[...], x,                           # (C_out, tl), MXU
                preferred_element_type=jnp.float32)
    y = y + b_ref[...]                                   # bias broadcast over L

    a = alpha_ref[0, 0]
    enc = jnp.where(y > 0, y, a * y)                     # PReLU, scalar slope

    enc_ref[0] = enc.astype(enc_ref.dtype)
    res_ref[0] = (0.5 * (x + enc)).astype(res_ref.dtype)


def conv1d_block(x, weight, bias, alpha, *, tl=512):
    """x: (N, C_in, L) f32; weight: (C_out, C_in); bias: (C_out,); alpha: scalar."""
    N, C_in, L = x.shape
    C_out = weight.shape[0]
    assert C_in == C_out, "residual 0.5*x + 0.5*enc(x) requires C_in == C_out"

    # Tile the L axis: either take the whole (possibly small) L, or a multiple
    # of 128 so the lane dimension stays aligned; pl.cdiv handles a ragged tail.
    if L <= tl:
        tl = L
    else:
        tl = max(128, (tl // 128) * 128)

    b2 = bias.reshape(C_out, 1)
    alpha2 = jnp.asarray(alpha, jnp.float32).reshape(1, 1)

    grid = (N, pl.cdiv(L, tl))

    res, enc = pl.pallas_call(
        _conv1d_block_kernel,
        out_shape=(jax.ShapeDtypeStruct((N, C_out, L), x.dtype),
                   jax.ShapeDtypeStruct((N, C_out, L), x.dtype)),
        grid_spec=pltpu.PrefetchScalarGridSpec(
            num_scalar_prefetch=0,
            grid=grid,
            in_specs=[
                pl.BlockSpec(memory_space=pltpu.MemorySpace.SMEM),        # alpha
                pl.BlockSpec((1, C_in, tl), lambda n, l: (n, 0, l)),      # x tile (NCL)
                pl.BlockSpec((C_out, C_in), lambda n, l: (0, 0)),         # W (resident)
                pl.BlockSpec((C_out, 1), lambda n, l: (0, 0)),            # bias (resident)
            ],
            out_specs=[
                pl.BlockSpec((1, C_out, tl), lambda n, l: (n, 0, l)),     # residual
                pl.BlockSpec((1, C_out, tl), lambda n, l: (n, 0, l)),     # enc
            ],
        ),
        compiler_params=pltpu.CompilerParams(
            dimension_semantics=("parallel", "parallel")),
    )(alpha2, x, weight, b2)

    return res, enc


def _reference(x, weight, bias, alpha):
    # Pure-JAX reference mirroring PyTorch Conv1d(k=1) + PReLU + residual.
    y = jnp.einsum("oc,ncl->nol", weight, x) + bias[None, :, None]
    enc = jnp.where(y > 0, y, alpha * y)
    return 0.5 * (x + enc), enc


if __name__ == "__main__":
    # Small, deterministic shapes consistent with the module (input == output channels).
    N, C, L = 2, 128, 64
    key = jax.random.PRNGKey(0)
    kx, kw, kb = jax.random.split(key, 3)

    x = jax.random.normal(kx, (N, C, L), dtype=jnp.float32)
    weight = jax.random.normal(kw, (C, C), dtype=jnp.float32) / jnp.sqrt(C)
    bias = jax.random.uniform(kb, (C,), dtype=jnp.float32, minval=-0.1, maxval=0.1)
    alpha = jnp.float32(0.25)   # nn.PReLU() default init

    res, enc = jax.block_until_ready(conv1d_block(x, weight, bias, alpha))
    res_ref, enc_ref = _reference(x, weight, bias, alpha)

    assert jnp.allclose(res, res_ref, atol=1e-4, rtol=1e-4)
    assert jnp.allclose(enc, enc_ref, atol=1e-4, rtol=1e-4)
    print("KERNEL_OK")
</pallas_src>

<mosaic_0001>
module attributes {stable_mosaic.version = 11 : i64} {
  func.func @_conv1d_block_kernel(%arg0: i32, %arg1: i32, %arg2: memref<1x1xf32, #tpu.memory_space<smem>>, %arg3: memref<1x128x64xf32, #tpu.memory_space<vmem>>, %arg4: memref<128x128xf32, #tpu.memory_space<vmem>>, %arg5: memref<128x1xf32, #tpu.memory_space<vmem>>, %arg6: memref<1x128x64xf32, #tpu.memory_space<vmem>>, %arg7: memref<1x128x64xf32, #tpu.memory_space<vmem>>) attributes {dimension_semantics = [#tpu.dimension_semantics<parallel>, #tpu.dimension_semantics<parallel>], iteration_bounds = array<i64: 2, 1>, scalar_prefetch = 0 : i64, scratch_operands = 0 : i64, tpu.core_type = #tpu.core_type<tc>, window_params = [{transform_indices = @transform_0, window_bounds = array<i64: 1, 1>}, {transform_indices = @transform_1, window_bounds = array<i64: 1, 128, 64>}, {pipeline_mode = #tpu.pipeline_mode<synchronous>, transform_indices = @transform_2, window_bounds = array<i64: 128, 128>}, {pipeline_mode = #tpu.pipeline_mode<synchronous>, transform_indices = @transform_3, window_bounds = array<i64: 128, 1>}, {transform_indices = @transform_4, window_bounds = array<i64: 1, 128, 64>}, {transform_indices = @transform_5, window_bounds = array<i64: 1, 128, 64>}]} {
    %c0 = arith.constant 0 : index
    %c0_0 = arith.constant 0 : index
    %c0_1 = arith.constant 0 : index
    %0 = vector.load %arg3[%c0, %c0_0, %c0_1] : memref<1x128x64xf32, #tpu.memory_space<vmem>>, vector<1x128x64xf32>
    %1 = vector.shape_cast %0 : vector<1x128x64xf32> to vector<128x64xf32>
    %c0_2 = arith.constant 0 : index
    %c0_3 = arith.constant 0 : index
    %2 = vector.load %arg4[%c0_2, %c0_3] : memref<128x128xf32, #tpu.memory_space<vmem>>, vector<128x128xf32>
    %cst = arith.constant dense<0.000000e+00> : vector<128x64xf32>
    %3 = tpu.matmul %2, %1, %cst {dimension_numbers = #tpu.dot_dimension_numbers<[1], [0], [0], [1], [0, 0, 1, 1], [], []>} : vector<128x128xf32>, vector<128x64xf32>, vector<128x64xf32> -> vector<128x64xf32>
    %c0_4 = arith.constant 0 : index
    %c0_5 = arith.constant 0 : index
    %4 = vector.load %arg5[%c0_4, %c0_5] : memref<128x1xf32, #tpu.memory_space<vmem>>, vector<128x1xf32>
    %5 = vector.broadcast %4 : vector<128x1xf32> to vector<128x64xf32>
    %6 = arith.addf %3, %5 : vector<128x64xf32>
    %c0_6 = arith.constant 0 : index
    %c0_7 = arith.constant 0 : index
    %7 = memref.load %arg2[%c0_6, %c0_7] : memref<1x1xf32, #tpu.memory_space<smem>>
    %cst_8 = arith.constant 0.000000e+00 : f32
    %8 = vector.broadcast %cst_8 : f32 to vector<128x64xf32>
    %9 = arith.cmpf ogt, %6, %8 : vector<128x64xf32>
    %10 = vector.broadcast %7 : f32 to vector<128x64xf32>
    %11 = arith.mulf %10, %6 : vector<128x64xf32>
    %12 = arith.select %9, %6, %11 : vector<128x64xi1>, vector<128x64xf32>
    %c0_9 = arith.constant 0 : index
    %c0_10 = arith.constant 0 : index
    %c0_11 = arith.constant 0 : index
    %13 = vector.load %arg7[%c0_9, %c0_10, %c0_11] : memref<1x128x64xf32, #tpu.memory_space<vmem>>, vector<1x128x64xf32>
    %14 = vector.shape_cast %13 : vector<1x128x64xf32> to vector<128x64xf32>
    %15 = vector.shape_cast %12 : vector<128x64xf32> to vector<1x128x64xf32>
    tpu.vector_store %arg7[%c0_9, %c0_10, %c0_11], %15 {strides = array<i32>} : memref<1x128x64xf32, #tpu.memory_space<vmem>>, vector<1x128x64xf32>,
    %16 = arith.addf %1, %12 : vector<128x64xf32>
    %cst_12 = arith.constant 5.000000e-01 : f32
    %17 = vector.broadcast %cst_12 : f32 to vector<128x64xf32>
    %18 = arith.mulf %17, %16 : vector<128x64xf32>
    %c0_13 = arith.constant 0 : index
    %c0_14 = arith.constant 0 : index
    %c0_15 = arith.constant 0 : index
    %19 = vector.load %arg6[%c0_13, %c0_14, %c0_15] : memref<1x128x64xf32, #tpu.memory_space<vmem>>, vector<1x128x64xf32>
    %20 = vector.shape_cast %19 : vector<1x128x64xf32> to vector<128x64xf32>
    %21 = vector.shape_cast %18 : vector<128x64xf32> to vector<1x128x64xf32>
    tpu.vector_store %arg6[%c0_13, %c0_14, %c0_15], %21 {strides = array<i32>} : memref<1x128x64xf32, #tpu.memory_space<vmem>>, vector<1x128x64xf32>,
    return
  }
  func.func @transform_0(%arg0: i32, %arg1: i32) -> (i32, i32) {
    %c0_i32 = arith.constant 0 : i32
    %c0_i32_0 = arith.constant 0 : i32
    %c0_i32_1 = arith.constant 0 : i32
    return %c0_i32, %c0_i32_0 : i32, i32
  }
  func.func @transform_1(%arg0: i32, %arg1: i32) -> (i32, i32, i32) {
    %c0_i32 = arith.constant 0 : i32
    %c0_i32_0 = arith.constant 0 : i32
    return %arg0, %c0_i32, %arg1 : i32, i32, i32
  }
  func.func @transform_2(%arg0: i32, %arg1: i32) -> (i32, i32) {
    %c0_i32 = arith.constant 0 : i32
    %c0_i32_0 = arith.constant 0 : i32
    %c0_i32_1 = arith.constant 0 : i32
    return %c0_i32, %c0_i32_0 : i32, i32
  }
  func.func @transform_3(%arg0: i32, %arg1: i32) -> (i32, i32) {
    %c0_i32 = arith.constant 0 : i32
    %c0_i32_0 = arith.constant 0 : i32
    %c0_i32_1 = arith.constant 0 : i32
    return %c0_i32, %c0_i32_0 : i32, i32
  }
  func.func @transform_4(%arg0: i32, %arg1: i32) -> (i32, i32, i32) {
    %c0_i32 = arith.constant 0 : i32
    %c0_i32_0 = arith.constant 0 : i32
    return %arg0, %c0_i32, %arg1 : i32, i32, i32
  }
  func.func @transform_5(%arg0: i32, %arg1: i32) -> (i32, i32, i32) {
    %c0_i32 = arith.constant 0 : i32
    %c0_i32_0 = arith.constant 0 : i32
    return %arg0, %c0_i32, %arg1 : i32, i32, i32
  }
}

</mosaic_0001>

<bundles_post_ra>
// kernel: tpu_custom_call.1
= control target key start
LH: loop header
LB: loop body
LE: loop exit
PB: predicated region body
PF: predicated region fallthrough
CT: control target
= control target key end

     0   :  { %s1017_s20 = smov 0   ;;  %s1019_s21 = smov 0   ;;  %s1387_s0 = inlined_call_operand.<no memory space> [shape: f32[1,1], index: 0, kind: input, shape index: {}]   ;;  %s1388_s1 = inlined_call_operand.vmem [shape: f32[2,128,64], index: 1, kind: input, shape index: {}]   ;;  %s1389_s2 = inlined_call_operand.vmem [shape: f32[128,128], index: 2, kind: input, shape index: {}]   ;;  %s1390_s3 = inlined_call_operand.vmem [shape: f32[128,1], index: 3, kind: input, shape index: {}]   ;;  %s1391_s4 = inlined_call_operand.vmem [shape: f32[2,128,64], index: 4, kind: output, shape index: {0}]   ;;  %s1392_s5 = inlined_call_operand.vmem [shape: f32[2,128,64], index: 5, kind: output, shape index: {1}]  }
   0x1   :  { %11 = sst [smem:[#allocation2]] %s1387_s0  ;;  %s1021_s22 = smov 0  }
   0x2 LB: > { %s29_s0 = sadd.s32 1, %s977_s21  ;;  %p800_p0 = scmp.ge.s32.totalorder %s981_s22, 1  ;;  %s981_s22 = sphi %s1021_s22, %s17_s22   ;;  %s977_s21 = sphi %s1019_s21, %s1394_s21   ;;  %s973_s20 = sphi %s1017_s20, %s1393_s20  }
   0x3   : > { %p31_p1 = scmp.ge.s32.totalorder %s29_s0, 2  ;;  %p212_p2 = scmp.lt.s32.totalorder %s981_s22, 3 }
   0x5   : > { %s1396_s0 = smov (%p31_p1, %s29_s0), 0  ;;  %p213_p3 = pnand %p800_p0, %p212_p2 }
   0x6   : > { %p254_p4 = scmp.lt.s32.totalorder (!%p213_p3), %s973_s20, 1  ;;  %s551_s24 = sld [smem:[#allocation2]] (!%p213_p3) }
   0x7   : > { %216 = sbr.rel (%p213_p3) target bundleno = 272 (0x110), region = 36 }
   0xc   : > { %v294_v0 = vld [vmem:[%s1389_s2] sm:$0xff]  ;;  %s1398_s20 = smov (!%p254_p4, %s973_s20), 1  ;;  %v983_v2 = vmov 0   ;;  %v312_v3 = vld [vmem:[%s1390_s3 + $0x10] sm:$0xff]  ;;  %v295_v21 = vld [vmem:[%s1389_s2 + $0x8] sm:$0xff]  ;;  %v1261_v59 = vstv %s551_s24  ;;  %vm601_vm0 = vcmask 523264  }
   0xd   : > { %v302_v1 = vld [vmem:[%s1389_s2 + $0x40] sm:$0xff]  ;;  %876 = vmatprep.mubr.f32.mxu0 %v294_v0  ;;  %958 = vset.pattern.permute.xlu1 %v983_v2  ;;  %s1041_s27 = sshll.u32 %s1398_s20, 7  ;;  %v303_v22 = vld [vmem:[%s1389_s2 + $0x48] sm:$0xff]  ;;  %v296_v23 = vld [vmem:[%s1389_s2 + $0x10] sm:$0xff] }
   0xe   : > { %888 = vmatprep.mubr.f32.mxu1 %v302_v1  ;;  %957 = vset.pattern.permute.xlu0 %v983_v2  ;;  %s1047_s30 = scalar_lea.vmem %s1388_s1, %s1041_s27  ;;  %v310_v4 = vld [vmem:[%s1390_s3] sm:$0xff]  ;;  %v304_v24 = vld [vmem:[%s1389_s2 + $0x50] sm:$0xff]  ;;  %v313_v25 = vld [vmem:[%s1390_s3 + $0x18] sm:$0xff]  ;;  %s1267_s28 = scalar_lea.vmem %s1392_s5, %s1041_s27 }
   0xf   : > { %v1056_v5 = vld [vmem:[%s1047_s30 + $0x78] sm:$0xff]  ;;  %v1059_v6 = vld [vmem:[%s1047_s30 + $0x70] sm:$0xff]  ;;  %338 = vperm.xlu1 %958, %v312_v3   ;;  %328 = vperm.xlu0 %957, %v310_v4   ;;  %v1066_v7 = vld [vmem:[%s1047_s30 + $0x68] sm:$0xff]  ;;  %s1282_s6 = scalar_lea.vmem %s1391_s4, %s1041_s27 }
  0x10   : > { %844 = vmatprep.subr.mxu0 %v1056_v5  ;;  %900 = vmatprep.subr.mxu1 %v1056_v5  ;;  %v1073_v8 = vld [vmem:[%s1047_s30 + $0x60] sm:$0xff]  ;;  %v1080_v9 = vld [vmem:[%s1047_s30 + $0x58] sm:$0xff]  ;;  %v1087_v10 = vld [vmem:[%s1047_s30 + $0x50] sm:$0xff] }
  0x11   : > { %845 = vmatpush3.msra.mxu0 %v1056_v5  ;;  %916 = vmatpush3.msra.mxu1 %v1056_v5  ;;  %v1094_v11 = vld [vmem:[%s1047_s30 + $0x48] sm:$0xff]  ;;  %v1101_v12 = vld [vmem:[%s1047_s30 + $0x40] sm:$0xff]  ;;  %v1108_v13 = vld [vmem:[%s1047_s30 + $0x38] sm:$0xff] }
  0x12   : > { %846 = vmatprep.subr.mxu0 %v1059_v6  ;;  %901 = vmatprep.subr.mxu1 %v1059_v6  ;;  %v1115_v14 = vld [vmem:[%s1047_s30 + $0x30] sm:$0xff]  ;;  %v1122_v15 = vld [vmem:[%s1047_s30 + $0x28] sm:$0xff]  ;;  %v1129_v16 = vld [vmem:[%s1047_s30 + $0x20] sm:$0xff] }
  0x13   : > { %847 = vmatpush3.msra.mxu0 %v1059_v6  ;;  %917 = vmatpush3.msra.mxu1 %v1059_v6  ;;  %v1136_v17 = vld [vmem:[%s1047_s30 + $0x18] sm:$0xff]  ;;  %v1143_v18 = vld [vmem:[%s1047_s30 + $0x10] sm:$0xff]  ;;  %v1150_v19 = vld [vmem:[%s1047_s30 + $0x8] sm:$0xff] }
  0x14   : > { %848 = vmatprep.subr.mxu0 %v1066_v7  ;;  %902 = vmatprep.subr.mxu1 %v1066_v7  ;;  %v1157_v20 = vld [vmem:[%s1047_s30] sm:$0xff]  ;;  %v311_v26 = vld [vmem:[%s1390_s3 + $0x8] sm:$0xff]  ;;  %v297_v27 = vld [vmem:[%s1389_s2 + $0x18] sm:$0xff] }
  0x15   : > { %849 = vmatpush3.msra.mxu0 %v1066_v7  ;;  %918 = vmatpush3.msra.mxu1 %v1066_v7  ;;  %v305_v28 = vld [vmem:[%s1389_s2 + $0x58] sm:$0xff]  ;;  %v298_v29 = vld [vmem:[%s1389_s2 + $0x20] sm:$0xff]  ;;  %v315_v31 = vld [vmem:[%s1390_s3 + $0x28] sm:$0xff] }
  0x16   : > { %850 = vmatprep.subr.mxu0 %v1073_v8  ;;  %903 = vmatprep.subr.mxu1 %v1073_v8  ;;  %v306_v30 = vld [vmem:[%s1389_s2 + $0x60] sm:$0xff]  ;;  %v299_v33 = vld [vmem:[%s1389_s2 + $0x28] sm:$0xff]  ;;  %v300_v35 = vld [vmem:[%s1389_s2 + $0x30] sm:$0xff] }
  0x17   : > { %851 = vmatpush3.msra.mxu0 %v1073_v8  ;;  %919 = vmatpush3.msra.mxu1 %v1073_v8  ;;  %v314_v32 = vld [vmem:[%s1390_s3 + $0x20] sm:$0xff]  ;;  %v307_v34 = vld [vmem:[%s1389_s2 + $0x68] sm:$0xff]  ;;  %v308_v36 = vld [vmem:[%s1389_s2 + $0x70] sm:$0xff] }
  0x18   : > { %852 = vmatprep.subr.mxu0 %v1080_v9  ;;  %904 = vmatprep.subr.mxu1 %v1080_v9  ;;  %v317_v37 = vld [vmem:[%s1390_s3 + $0x38] sm:$0xff]  ;;  %v316_v38 = vld [vmem:[%s1390_s3 + $0x30] sm:$0xff]  ;;  %v319_v41 = vld [vmem:[%s1390_s3 + $0x48] sm:$0xff] }
  0x19   : > { %853 = vmatpush3.msra.mxu0 %v1080_v9  ;;  %920 = vmatpush3.msra.mxu1 %v1080_v9  ;;  %v301_v39 = vld [vmem:[%s1389_s2 + $0x38] sm:$0xff]  ;;  %v318_v42 = vld [vmem:[%s1390_s3 + $0x40] sm:$0xff]  ;;  %v320_v44 = vld [vmem:[%s1390_s3 + $0x50] sm:$0xff] }
  0x1a   : > { %854 = vmatprep.subr.mxu0 %v1087_v10  ;;  %905 = vmatprep.subr.mxu1 %v1087_v10  ;;  %v309_v40 = vld [vmem:[%s1389_s2 + $0x78] sm:$0xff]  ;;  %v323_v45 = vld [vmem:[%s1390_s3 + $0x68] sm:$0xff]  ;;  %v322_v46 = vld [vmem:[%s1390_s3 + $0x60] sm:$0xff] }
  0x1b   : > { %855 = vmatpush3.msra.mxu0 %v1087_v10  ;;  %921 = vmatpush3.msra.mxu1 %v1087_v10  ;;  %v321_v43 = vld [vmem:[%s1390_s3 + $0x58] sm:$0xff]  ;;  %v324_v48 = vld [vmem:[%s1390_s3 + $0x70] sm:$0xff] }
  0x1c   : > { %856 = vmatprep.subr.mxu0 %v1094_v11  ;;  %906 = vmatprep.subr.mxu1 %v1094_v11  ;;  %v325_v47 = vld [vmem:[%s1390_s3 + $0x78] sm:$0xff] }
  0x1d   : > { %857 = vmatpush3.msra.mxu0 %v1094_v11  ;;  %922 = vmatpush3.msra.mxu1 %v1094_v11 }
  0x1e   : > { %858 = vmatprep.subr.mxu0 %v1101_v12  ;;  %907 = vmatprep.subr.mxu1 %v1101_v12 }
  0x1f   : > { %859 = vmatpush3.msra.mxu0 %v1101_v12  ;;  %923 = vmatpush3.msra.mxu1 %v1101_v12 }
  0x20   : > { %860 = vmatprep.subr.mxu0 %v1108_v13  ;;  %908 = vmatprep.subr.mxu1 %v1108_v13 }
  0x21   : > { %861 = vmatpush3.msra.mxu0 %v1108_v13  ;;  %924 = vmatpush3.msra.mxu1 %v1108_v13 }
  0x22   : > { %862 = vmatprep.subr.mxu0 %v1115_v14  ;;  %909 = vmatprep.subr.mxu1 %v1115_v14 }
  0x23   : > { %863 = vmatpush3.msra.mxu0 %v1115_v14  ;;  %925 = vmatpush3.msra.mxu1 %v1115_v14 }
  0x24   : > { %864 = vmatprep.subr.mxu0 %v1122_v15  ;;  %910 = vmatprep.subr.mxu1 %v1122_v15 }
  0x25   : > { %865 = vmatpush3.msra.mxu0 %v1122_v15  ;;  %926 = vmatpush3.msra.mxu1 %v1122_v15 }
  0x26   : > { %866 = vmatprep.subr.mxu0 %v1129_v16  ;;  %911 = vmatprep.subr.mxu1 %v1129_v16 }
  0x27   : > { %867 = vmatpush3.msra.mxu0 %v1129_v16  ;;  %927 = vmatpush3.msra.mxu1 %v1129_v16 }
  0x28   : > { %868 = vmatprep.subr.mxu0 %v1136_v17  ;;  %912 = vmatprep.subr.mxu1 %v1136_v17 }
  0x29   : > { %869 = vmatpush3.msra.mxu0 %v1136_v17  ;;  %928 = vmatpush3.msra.mxu1 %v1136_v17 }
  0x2a   : > { %870 = vmatprep.subr.mxu0 %v1143_v18  ;;  %913 = vmatprep.subr.mxu1 %v1143_v18 }
  0x2b   : > { %871 = vmatpush3.msra.mxu0 %v1143_v18  ;;  %929 = vmatpush3.msra.mxu1 %v1143_v18 }
  0x2c   : > { %872 = vmatprep.subr.mxu0 %v1150_v19  ;;  %914 = vmatprep.subr.mxu1 %v1150_v19 }
  0x2d   : > { %873 = vmatpush3.msra.mxu0 %v1150_v19  ;;  %930 = vmatpush3.msra.mxu1 %v1150_v19 }
  0x2e   : > { %874 = vmatprep.subr.mxu0 %v1157_v20  ;;  %915 = vmatprep.subr.mxu1 %v1157_v20 }
  0x2f   : > { %875 = vmatpush3.msra.mxu0 %v1157_v20  ;;  %931 = vmatpush3.msra.mxu1 %v1157_v20 }
  0x30   : > { %877 = vmatmul.mubr.f32.vlgmr.msra.gmra.mxu0 %v295_v21  ;;  %889 = vmatmul.mubr.f32.vlgmr.msra.gmra.mxu1 %v303_v22 }
  0x31   : > { %879 = vmatprep.mubr.f32.mxu0 %v296_v23  ;;  %891 = vmatprep.mubr.f32.mxu1 %v304_v24 }
  0x32   : > { %343 = vperm.xlu1 %958, %v313_v25   ;;  %333 = vperm.xlu0 %957, %v311_v26  }
  0x34   : > { %880 = vmatmul.mubr.f32.gmra.mxu0 %v297_v27  ;;  %892 = vmatmul.mubr.f32.gmra.mxu1 %v305_v28 }
  0x35   : > { %882 = vmatprep.mubr.f32.mxu0 %v298_v29  ;;  %894 = vmatprep.mubr.f32.mxu1 %v306_v30 }
  0x36   : > { %353 = vperm.xlu1 %958, %v315_v31   ;;  %348 = vperm.xlu0 %957, %v314_v32  }
  0x38   : > { %883 = vmatmul.mubr.f32.gmra.mxu0 %v299_v33  ;;  %895 = vmatmul.mubr.f32.gmra.mxu1 %v307_v34 }
  0x39   : > { %885 = vmatprep.mubr.f32.mxu0 %v300_v35  ;;  %897 = vmatprep.mubr.f32.mxu1 %v308_v36 }
  0x3a   : > { %363 = vperm.xlu1 %958, %v317_v37   ;;  %358 = vperm.xlu0 %957, %v316_v38  }
  0x3c   : > { %886 = vmatmul.mubr.f32.gmra.mxu0 %v301_v39  ;;  %898 = vmatmul.mubr.f32.gmra.mxu1 %v309_v40 }
  0x3e   : > { %373 = vperm.xlu1 %958, %v319_v41   ;;  %368 = vperm.xlu0 %957, %v318_v42  }
  0x42   : > { %383 = vperm.xlu1 %958, %v321_v43   ;;  %378 = vperm.xlu0 %957, %v320_v44  }
  0x46   : > { %393 = vperm.xlu1 %958, %v323_v45   ;;  %388 = vperm.xlu0 %957, %v322_v46  }
  0x4a   : > { %403 = vperm.xlu1 %958, %v325_v47   ;;  %398 = vperm.xlu0 %957, %v324_v48  }
  0x8a   : > { %v1251_v49 = vpop.permute.xlu1 %338  ;;  %v329_v50 = vpop.permute.xlu0 %328 }
  0xad   : > { %v344_v51 = vpop.permute.xlu1 %343  ;;  %v334_v52 = vpop.permute.xlu0 %333 }
  0xb1   : > { %v1253_v53 = vpop.permute.xlu1 %353  ;;  %v1255_v54 = vpop.permute.xlu0 %348 }
  0xb5   : > { %v1257_v55 = vpop.permute.xlu1 %363  ;;  %v1259_v56 = vpop.permute.xlu0 %358 }
  0xb9   : > { %v374_v57 = vpop.permute.xlu1 %373  ;;  %v369_v61 = vpop.permute.xlu0 %368 }
  0xbd   : > { %v384_v2 = vpop.permute.xlu1 %383  ;;  %v379_v34 = vpop.permute.xlu0 %378 }
  0xc1   : > { %v394_v40 = vpop.permute.xlu1 %393 }
  0xf0   : > { %v878_v58 = vpop.f32.mrf.mxu0  ;;  %v890_v60 = vpop.f32.mrf.mxu1 }
  0xf1   : > { %v478_v62 = vadd.f32 %v878_v58, %v334_v52  ;;  %v518_v63 = vadd.f32 %v890_v60, %v374_v57 }
  0xf2   : > { %v472_v0 = vpop.f32.mrf.mxu0  ;;  %v512_v1 = vpop.f32.mrf.mxu1 }
  0xf3   : > { %vm553_vm1 = vcmp.gt.f32.partialorder %v478_v62, 0.0  ;;  %v570_v3 = vmul.f32 %v1261_v59, %v478_v62  ;;  %vm561_vm2 = vcmp.gt.f32.partialorder %v518_v63, 0.0  ;;  %v578_v4 = vmul.f32 %v1261_v59, %v518_v63 }
  0xf4   : > { %v473_v21 = vadd.f32 %v472_v0, %v329_v50  ;;  %v513_v22 = vadd.f32 %v512_v1, %v369_v61  ;;  %v881_v23 = vpop.f32.mrf.mxu0  ;;  %v893_v24 = vpop.f32.mrf.mxu1 }
  0xf5   : > { %v586_v25 = vsel %vm553_vm1, %v478_v62, %v570_v3  ;;  %v594_v26 = vsel %vm561_vm2, %v518_v63, %v578_v4  ;;  %v488_v27 = vadd.f32 %v881_v23, %v344_v51  ;;  %v528_v28 = vadd.f32 %v893_v24, %v384_v2 }
  0xf6   : > { %603 = vst.msk [vmem:[%s1267_s28 + $0x8] sm:$0xff] %vm601_vm0, %v586_v25  ;;  %v619_v29 = vadd.f32 %v586_v25, %v1150_v19  ;;  %611 = vst.msk [vmem:[%s1267_s28 + $0x48] sm:$0xff] %vm601_vm0, %v594_v26  ;;  %v627_v30 = vadd.f32 %v594_v26, %v1094_v11  ;;  %vm552_vm3 = vcmp.gt.f32.partialorder %v473_v21, 0.0  ;;  %v569_v31 = vmul.f32 %v1261_v59, %v473_v21  ;;  %v482_v32 = vpop.f32.mrf.mxu0  ;;  %v522_v33 = vpop.f32.mrf.mxu1 }
  0xf7   : > { %vm560_vm4 = vcmp.gt.f32.partialorder %v513_v22, 0.0  ;;  %v577_v19 = vmul.f32 %v1261_v59, %v513_v22  ;;  %vm555_vm5 = vcmp.gt.f32.partialorder %v488_v27, 0.0  ;;  %v572_v11 = vmul.f32 %v1261_v59, %v488_v27 }
  0xf8   : > { %v635_v35 = vmul.f32 0.5, %v619_v29  ;;  %v643_v36 = vmul.f32 0.5, %v627_v30  ;;  %v585_v37 = vsel %vm552_vm3, %v473_v21, %v569_v31  ;;  %vm563_vm6 = vcmp.gt.f32.partialorder %v528_v28, 0.0  ;;  %v884_v38 = vpop.f32.mrf.mxu0  ;;  %v896_v39 = vpop.f32.mrf.mxu1 }
  0xf9   : > { %602 = vst.msk [vmem:[%s1267_s28] sm:$0xff] %vm601_vm0, %v585_v37  ;;  %v618_v41 = vadd.f32 %v585_v37, %v1157_v20  ;;  %v593_v42 = vsel %vm560_vm4, %v513_v22, %v577_v19  ;;  %v588_v43 = vsel %vm555_vm5, %v488_v27, %v572_v11  ;;  %v580_v44 = vmul.f32 %v1261_v59, %v528_v28 }
  0xfa   : > { %651 = vst.msk [vmem:[%s1282_s6 + $0x8] sm:$0xff] %vm601_vm0, %v635_v35  ;;  %659 = vst.msk [vmem:[%s1282_s6 + $0x48] sm:$0xff] %vm601_vm0, %v643_v36  ;;  %v626_v45 = vadd.f32 %v593_v42, %v1101_v12  ;;  %v621_v46 = vadd.f32 %v588_v43, %v1136_v17  ;;  %v483_v20 = vadd.f32 %v482_v32, %v1251_v49  ;;  %v492_v48 = vpop.f32.mrf.mxu0  ;;  %v532_v50 = vpop.f32.mrf.mxu1 }
  0xfb   : > { %610 = vst.msk [vmem:[%s1267_s28 + $0x40] sm:$0xff] %vm601_vm0, %v593_v42  ;;  %605 = vst.msk [vmem:[%s1267_s28 + $0x18] sm:$0xff] %vm601_vm0, %v588_v43  ;;  %v523_v47 = vadd.f32 %v522_v33, %v379_v34  ;;  %v634_v51 = vmul.f32 0.5, %v618_v41  ;;  %v596_v52 = vsel %vm563_vm6, %v528_v28, %v580_v44  ;;  %v498_v57 = vadd.f32 %v884_v38, %v1253_v53  ;;  %v389_v53 = vpop.permute.xlu0 %388 }
  0xfc   : > { %v538_v58 = vadd.f32 %v896_v39, %v394_v40  ;;  %v642_v60 = vmul.f32 0.5, %v626_v45  ;;  %v637_v12 = vmul.f32 0.5, %v621_v46  ;;  %613 = vst.msk [vmem:[%s1267_s28 + $0x58] sm:$0xff] %vm601_vm0, %v596_v52  ;;  %v629_v61 = vadd.f32 %v596_v52, %v1080_v9  ;;  %v887_v62 = vpop.f32.mrf.mxu0  ;;  %v899_v1 = vpop.f32.mrf.mxu1 }
  0xfd   : > { %vm554_vm7 = vcmp.gt.f32.partialorder %v483_v20, 0.0  ;;  %650 = vst.msk [vmem:[%s1282_s6] sm:$0xff] %vm601_vm0, %v634_v51  ;;  %v571_v17 = vmul.f32 %v1261_v59, %v483_v20  ;;  %vm562_vm8 = vcmp.gt.f32.partialorder %v523_v47, 0.0  ;;  %v579_v49 = vmul.f32 %v1261_v59, %v523_v47 }
  0xfe   : > { %vm557_vm9 = vcmp.gt.f32.partialorder %v498_v57, 0.0  ;;  %658 = vst.msk [vmem:[%s1282_s6 + $0x40] sm:$0xff] %vm601_vm0, %v642_v60  ;;  %653 = vst.msk [vmem:[%s1282_s6 + $0x18] sm:$0xff] %vm601_vm0, %v637_v12  ;;  %v645_v63 = vmul.f32 0.5, %v629_v61  ;;  %v574_v9 = vmul.f32 %v1261_v59, %v498_v57  ;;  %vm565_vm10 = vcmp.gt.f32.partialorder %v538_v58, 0.0  ;;  %v502_v27 = vpop.f32.mrf.mxu0  ;;  %v542_v30 = vpop.f32.mrf.mxu1 }
  0xff   : > { %v582_v0 = vmul.f32 %v1261_v59, %v538_v58  ;;  %v587_v2 = vsel %vm554_vm7, %v483_v20, %v571_v17  ;;  %v595_v3 = vsel %vm562_vm8, %v523_v47, %v579_v49  ;;  %v493_v4 = vadd.f32 %v492_v48, %v1255_v54  ;;  %v399_v34 = vpop.permute.xlu0 %398 }
 0x100   : > { %v533_v21 = vadd.f32 %v532_v50, %v389_v53  ;;  %661 = vst.msk [vmem:[%s1282_s6 + $0x58] sm:$0xff] %vm601_vm0, %v645_v63  ;;  %604 = vst.msk [vmem:[%s1267_s28 + $0x10] sm:$0xff] %vm601_vm0, %v587_v2  ;;  %v620_v22 = vadd.f32 %v587_v2, %v1143_v18  ;;  %v628_v23 = vadd.f32 %v595_v3, %v1087_v10 }
 0x101   : > { %612 = vst.msk [vmem:[%s1267_s28 + $0x50] sm:$0xff] %vm601_vm0, %v595_v3  ;;  %v590_v24 = vsel %vm557_vm9, %v498_v57, %v574_v9  ;;  %v598_v25 = vsel %vm565_vm10, %v538_v58, %v582_v0  ;;  %vm556_vm11 = vcmp.gt.f32.partialorder %v493_v4, 0.0  ;;  %v573_v18 = vmul.f32 %v1261_v59, %v493_v4 }
 0x102   : > { %607 = vst.msk [vmem:[%s1267_s28 + $0x28] sm:$0xff] %vm601_vm0, %v590_v24  ;;  %v623_v26 = vadd.f32 %v590_v24, %v1122_v15  ;;  %615 = vst.msk [vmem:[%s1267_s28 + $0x68] sm:$0xff] %vm601_vm0, %v598_v25  ;;  %v631_v54 = vadd.f32 %v598_v25, %v1066_v7  ;;  %v636_v28 = vmul.f32 0.5, %v620_v22  ;;  %v644_v10 = vmul.f32 0.5, %v628_v23  ;;  %v404_v15 = vpop.permute.xlu1 %403 }
 0x103   : > { %vm564_vm12 = vcmp.gt.f32.partialorder %v533_v21, 0.0  ;;  %v581_v29 = vmul.f32 %v1261_v59, %v533_v21  ;;  %v589_v33 = vsel %vm556_vm11, %v493_v4, %v573_v18  ;;  %v508_v7 = vadd.f32 %v887_v62, %v1257_v55 }
 0x104   : > { %v639_v31 = vmul.f32 0.5, %v623_v26  ;;  %v647_v32 = vmul.f32 0.5, %v631_v54  ;;  %652 = vst.msk [vmem:[%s1282_s6 + $0x10] sm:$0xff] %vm601_vm0, %v636_v28  ;;  %660 = vst.msk [vmem:[%s1282_s6 + $0x50] sm:$0xff] %vm601_vm0, %v644_v10  ;;  %v622_v19 = vadd.f32 %v589_v33, %v1129_v16  ;;  %v548_v35 = vadd.f32 %v899_v1, %v404_v15 }
 0x105   : > { %606 = vst.msk [vmem:[%s1267_s28 + $0x20] sm:$0xff] %vm601_vm0, %v589_v33  ;;  %v597_v11 = vsel %vm564_vm12, %v533_v21, %v581_v29  ;;  %v503_v36 = vadd.f32 %v502_v27, %v1259_v56  ;;  %vm559_vm13 = vcmp.gt.f32.partialorder %v508_v7, 0.0  ;;  %v576_v37 = vmul.f32 %v1261_v59, %v508_v7 }
 0x106   : > { %655 = vst.msk [vmem:[%s1282_s6 + $0x28] sm:$0xff] %vm601_vm0, %v639_v31  ;;  %663 = vst.msk [vmem:[%s1282_s6 + $0x68] sm:$0xff] %vm601_vm0, %v647_v32  ;;  %v630_v55 = vadd.f32 %v597_v11, %v1073_v8  ;;  %v543_v16 = vadd.f32 %v542_v30, %v399_v34  ;;  %v638_v38 = vmul.f32 0.5, %v622_v19  ;;  %vm567_vm14 = vcmp.gt.f32.partialorder %v548_v35, 0.0 }
 0x107   : > { %614 = vst.msk [vmem:[%s1267_s28 + $0x60] sm:$0xff] %vm601_vm0, %v597_v11  ;;  %v584_v56 = vmul.f32 %v1261_v59, %v548_v35  ;;  %vm558_vm15 = vcmp.gt.f32.partialorder %v503_v36, 0.0  ;;  %v592_v40 = vsel %vm559_vm13, %v508_v7, %v576_v37  ;;  %v575_v41 = vmul.f32 %v1261_v59, %v503_v36 }
 0x108   : > { %v646_v39 = vmul.f32 0.5, %v630_v55  ;;  %vm566_vm1 = vcmp.gt.f32.partialorder %v543_v16, 0.0  ;;  %654 = vst.msk [vmem:[%s1282_s6 + $0x20] sm:$0xff] %vm601_vm0, %v638_v38  ;;  %609 = vst.msk [vmem:[%s1267_s28 + $0x38] sm:$0xff] %vm601_vm0, %v592_v40  ;;  %v625_v8 = vadd.f32 %v592_v40, %v1108_v13  ;;  %v583_v43 = vmul.f32 %v1261_v59, %v543_v16 }
 0x109   : > { %v600_v42 = vsel %vm567_vm14, %v548_v35, %v584_v56  ;;  %v591_v45 = vsel %vm558_vm15, %v503_v36, %v575_v41 }
 0x10a   : > { %662 = vst.msk [vmem:[%s1282_s6 + $0x60] sm:$0xff] %vm601_vm0, %v646_v39  ;;  %617 = vst.msk [vmem:[%s1267_s28 + $0x78] sm:$0xff] %vm601_vm0, %v600_v42  ;;  %v633_v44 = vadd.f32 %v600_v42, %v1056_v5  ;;  %v641_v46 = vmul.f32 0.5, %v625_v8  ;;  %v624_v20 = vadd.f32 %v591_v45, %v1115_v14  ;;  %v599_v47 = vsel %vm566_vm1, %v543_v16, %v583_v43 }
 0x10b   : > { %608 = vst.msk [vmem:[%s1267_s28 + $0x30] sm:$0xff] %vm601_vm0, %v591_v45  ;;  %616 = vst.msk [vmem:[%s1267_s28 + $0x70] sm:$0xff] %vm601_vm0, %v599_v47  ;;  %v632_v59 = vadd.f32 %v599_v47, %v1059_v6 }
 0x10c   : > { %v649_v13 = vmul.f32 0.5, %v633_v44  ;;  %657 = vst.msk [vmem:[%s1282_s6 + $0x38] sm:$0xff] %vm601_vm0, %v641_v46  ;;  %v640_v48 = vmul.f32 0.5, %v624_v20 }
 0x10d   : > { %v648_v50 = vmul.f32 0.5, %v632_v59 }
 0x10e   : > { %665 = vst.msk [vmem:[%s1282_s6 + $0x78] sm:$0xff] %vm601_vm0, %v649_v13  ;;  %656 = vst.msk [vmem:[%s1282_s6 + $0x30] sm:$0xff] %vm601_vm0, %v640_v48 }
 0x10f   : > { %664 = vst.msk [vmem:[%s1282_s6 + $0x70] sm:$0xff] %vm601_vm0, %v648_v50 }
 0x110 PF: > { %s17_s22 = sadd.s32 1, %s981_s22   ;;  %s1393_s20 = smov %s977_s21 }
 0x111   : > { %p14_p5 = scmp.ge.s32.totalorder %s17_s22, 4   ;;  %s1394_s21 = smov %s1396_s0 }
 0x113   :  { %16 = sbr.rel (!%p14_p5) target bundleno = 2 (0x2), region = 78 }

</bundles_post_ra>
